<compile_context>
chip_gen: v7x
topology: tpu7x:2x2x1
jax: 0.10.0
libtpu: 0.0.40
codegen_flags: <defaults>
</compile_context>

<pallas_src>
import jax
import jax.numpy as jnp
from jax.experimental import pallas as pl
from jax.experimental.pallas import tpu as pltpu


def _cdiv(a, b):
    return -(-a // b)


def _outconv_kernel_vpu(x_ref, w_ref, b_ref, o_ref):
    """Tiny-channel path: dense (8,128)-slab broadcast-FMAs on the VPU.

    x_ref: (nb, Cin, R, 128)  VMEM block (spatial rows on sublanes, lanes=128)
    w_ref: (Cout, Cin)        SMEM (f32 scalars)
    b_ref: (Cout,)            SMEM (f32 scalars)
    o_ref: (nb, Cout, R, 128) VMEM block
    """
    cin = x_ref.shape[1]
    cout = o_ref.shape[1]
    for co in range(cout):                      # unrolled: channel counts are tiny
        acc = x_ref[:, 0, :, :] * w_ref[co, 0]  # per-op promotion handles bf16 in
        for ci in range(1, cin):
            acc = acc + x_ref[:, ci, :, :] * w_ref[co, ci]
        o_ref[:, co, :, :] = (acc + b_ref[co]).astype(o_ref.dtype)


def _outconv_kernel_mxu(x_ref, w_ref, b_ref, o_ref):
    """Large-channel path: (Cout, Cin) @ (Cin, T) on the MXU.

    x_ref: (1, Cin, T)  VMEM block
    w_ref: (Cout, Cin)  VMEM
    b_ref: (Cout, 1)    VMEM (f32)
    o_ref: (1, Cout, T) VMEM block
    """
    acc = jnp.dot(w_ref[...], x_ref[0], preferred_element_type=jnp.float32)
    o_ref[0] = (acc + b_ref[...]).astype(o_ref.dtype)


@jax.jit
def out_conv(x, weight, bias):
    """1x1 Conv2d forward (NCHW, PyTorch convention).

    x:      (N, Cin, H, W)
    weight: (Cout, Cin, 1, 1)
    bias:   (Cout,)
    returns (N, Cout, H, W)
    """
    N, Cin, H, W = x.shape
    Cout = weight.shape[0]
    HW = H * W
    dt = x.dtype.itemsize

    w2d = weight.reshape(Cout, Cin)

    # Pad the flattened spatial axis to a lane multiple (usually a no-op).
    HW_pad = _cdiv(HW, 128) * 128
    x3 = x.reshape(N, Cin, HW)
    if HW_pad != HW:
        # TODO(synk): pad/slice round-trips HBM for ragged H*W; acceptable vs.
        # blowing VMEM with a single full-extent block.
        x3 = jnp.pad(x3, ((0, 0), (0, 0), (0, HW_pad - HW)))
    S = HW_pad // 128

    # Double-buffered (input + output) block budget: safe on v7x's 64 MiB
    # VMEM and comfortably inside the explicit scoped limit set below.
    footprint_budget = 16 << 20
    vmem_limit = 32 << 20

    total_io_bytes = N * (Cin + Cout) * HW_pad * dt
    cost = pl.CostEstimate(
        flops=2 * N * Cout * Cin * HW,
        transcendentals=0,
        bytes_accessed=total_io_bytes + (Cout * Cin + Cout) * 4,
    )

    use_vpu = (Cin * Cout) <= 64  # mid/large channel counts go to the MXU

    if use_vpu:
        # Block = (nb, Cin, rows, 128) in / (nb, Cout, rows, 128) out.
        bytes_per_row = 2 * (Cin + Cout) * 128 * dt      # double-buffered, per spatial row
        max_rows = max(8, footprint_budget // bytes_per_row)
        if max_rows >= S:
            rows = S                                     # whole image per step
            nb = max(1, min(N, footprint_budget // (bytes_per_row * S)))
        else:
            nb = 1
            rows = max(8, (max_rows // 8) * 8)           # (8,128)-aligned spatial tile

        # Keep >= 2 grid steps when there is real work, so v7x's two
        # TensorCores both run and the DMA/compute pipeline can overlap.
        if _cdiv(N, nb) * _cdiv(S, rows) == 1 and total_io_bytes >= (1 << 20):
            if nb > 1:
                nb = _cdiv(nb, 2)
            elif S >= 16:
                rows = max(8, _cdiv(_cdiv(S, 2), 8) * 8)

        grid = (_cdiv(N, nb), _cdiv(S, rows))
        x4 = x3.reshape(N, Cin, S, 128)                  # free view

        out4 = pl.pallas_call(
            _outconv_kernel_vpu,
            out_shape=jax.ShapeDtypeStruct((N, Cout, S, 128), x.dtype),
            grid=grid,
            in_specs=[
                pl.BlockSpec((nb, Cin, rows, 128), lambda b, s: (b, 0, s, 0)),
                pl.BlockSpec(memory_space=pltpu.MemorySpace.SMEM),
                pl.BlockSpec(memory_space=pltpu.MemorySpace.SMEM),
            ],
            out_specs=pl.BlockSpec((nb, Cout, rows, 128),
                                   lambda b, s: (b, 0, s, 0)),
            compiler_params=pltpu.CompilerParams(
                dimension_semantics=("parallel", "parallel"),
                vmem_limit_bytes=vmem_limit),
            cost_estimate=cost,
        )(x4, w2d.astype(jnp.float32), bias.astype(jnp.float32))
        out3 = out4.reshape(N, Cout, HW_pad)
    else:
        # MXU path: lane-dense spatial tiles, Cin/Cout dense on sublanes.
        tile_hw = (footprint_budget // (2 * (Cin + Cout) * dt)) // 128 * 128
        tile_hw = max(128, min(tile_hw, HW_pad))
        grid = (N, _cdiv(HW_pad, tile_hw))

        out3 = pl.pallas_call(
            _outconv_kernel_mxu,
            out_shape=jax.ShapeDtypeStruct((N, Cout, HW_pad), x.dtype),
            grid=grid,
            in_specs=[
                pl.BlockSpec((1, Cin, tile_hw), lambda n, t: (n, 0, t)),
                pl.BlockSpec((Cout, Cin), lambda n, t: (0, 0)),
                pl.BlockSpec((Cout, 1), lambda n, t: (0, 0)),
            ],
            out_specs=pl.BlockSpec((1, Cout, tile_hw), lambda n, t: (n, 0, t)),
            compiler_params=pltpu.CompilerParams(
                dimension_semantics=("parallel", "parallel"),
                vmem_limit_bytes=vmem_limit),
            cost_estimate=cost,
        )(x3, w2d.astype(x.dtype), bias.astype(jnp.float32).reshape(Cout, 1))

    if HW_pad != HW:
        out3 = out3[:, :, :HW]
    return out3.reshape(N, Cout, H, W)


def _reference(x, weight, bias):
    Cout, Cin = weight.shape[0], weight.shape[1]
    return (jnp.einsum("nchw,oc->nohw", x, weight.reshape(Cout, Cin))
            + bias[None, :, None, None])


if __name__ == "__main__":
    key = jax.random.PRNGKey(0)

    # 1) Main check: shapes consistent with OutConv(in_channels=4, out_channels=3).
    N, Cin, Cout, H, W = 2, 4, 3, 16, 16
    kx, kw, kb, key = *jax.random.split(key, 3), jax.random.split(key, 4)[3]
    x = jax.random.normal(kx, (N, Cin, H, W), dtype=jnp.float32)
    weight = jax.random.normal(kw, (Cout, Cin, 1, 1), dtype=jnp.float32) * 0.1
    bias = jax.random.normal(kb, (Cout,), dtype=jnp.float32) * 0.1

    out = jax.block_until_ready(out_conv(x, weight, bias))
    assert out.shape == (N, Cout, H, W)
    assert jnp.allclose(out, _reference(x, weight, bias), atol=1e-5, rtol=1e-5)

    # 2) Ragged spatial extent (exercises the pad path): H*W = 100 -> padded 128.
    kx2, kw2, kb2, key = *jax.random.split(key, 3), jax.random.split(key, 4)[3]
    x2 = jax.random.normal(kx2, (1, 4, 10, 10), dtype=jnp.float32)
    w2 = jax.random.normal(kw2, (2, 4, 1, 1), dtype=jnp.float32) * 0.1
    b2 = jax.random.normal(kb2, (2,), dtype=jnp.float32) * 0.1
    out2 = jax.block_until_ready(out_conv(x2, w2, b2))
    assert out2.shape == (1, 2, 10, 10)
    assert jnp.allclose(out2, _reference(x2, w2, b2), atol=1e-5, rtol=1e-5)

    # 3) Large-channel MXU path.
    kx3, kw3, kb3, _ = jax.random.split(key, 4)
    x3 = jax.random.normal(kx3, (1, 96, 16, 16), dtype=jnp.float32)
    w3 = jax.random.normal(kw3, (8, 96, 1, 1), dtype=jnp.float32) * 0.05
    b3 = jax.random.normal(kb3, (8,), dtype=jnp.float32) * 0.1
    out3 = jax.block_until_ready(out_conv(x3, w3, b3))
    assert out3.shape == (1, 8, 16, 16)
    assert jnp.allclose(out3, _reference(x3, w3, b3), atol=1e-4, rtol=1e-4)

    print("KERNEL_OK")
</pallas_src>

<mosaic_0001>
module attributes {stable_mosaic.version = 11 : i64} {
  func.func @_outconv_kernel_vpu(%arg0: i32, %arg1: i32, %arg2: memref<2x4x2x128xf32, #tpu.memory_space<vmem>>, %arg3: memref<3x4xf32, #tpu.memory_space<smem>>, %arg4: memref<3xf32, #tpu.memory_space<smem>>, %arg5: memref<2x3x2x128xf32, #tpu.memory_space<vmem>>) attributes {dimension_semantics = [#tpu.dimension_semantics<parallel>, #tpu.dimension_semantics<parallel>], iteration_bounds = array<i64: 1, 1>, scalar_prefetch = 0 : i64, scratch_operands = 0 : i64, tpu.core_type = #tpu.core_type<tc>, window_params = [{transform_indices = @transform_0, window_bounds = array<i64: 2, 4, 2, 128>}, {transform_indices = @transform_1, window_bounds = array<i64: 3, 4>}, {transform_indices = @transform_2, window_bounds = array<i64: 3>}, {transform_indices = @transform_3, window_bounds = array<i64: 2, 3, 2, 128>}]} {
    %c0 = arith.constant 0 : index
    %c0_0 = arith.constant 0 : index
    %c0_1 = arith.constant 0 : index
    %c0_2 = arith.constant 0 : index
    %0 = vector.load %arg2[%c0, %c0_0, %c0_1, %c0_2] : memref<2x4x2x128xf32, #tpu.memory_space<vmem>>, vector<2x1x2x128xf32>
    %1 = vector.shape_cast %0 : vector<2x1x2x128xf32> to vector<2x2x128xf32>
    %c0_3 = arith.constant 0 : index
    %c0_4 = arith.constant 0 : index
    %2 = memref.load %arg3[%c0_3, %c0_4] : memref<3x4xf32, #tpu.memory_space<smem>>
    %3 = vector.broadcast %2 : f32 to vector<2x2x128xf32>
    %4 = arith.mulf %1, %3 : vector<2x2x128xf32>
    %c0_5 = arith.constant 0 : index
    %c1 = arith.constant 1 : index
    %c0_6 = arith.constant 0 : index
    %c0_7 = arith.constant 0 : index
    %5 = vector.load %arg2[%c0_5, %c1, %c0_6, %c0_7] : memref<2x4x2x128xf32, #tpu.memory_space<vmem>>, vector<2x1x2x128xf32>
    %6 = vector.shape_cast %5 : vector<2x1x2x128xf32> to vector<2x2x128xf32>
    %c0_8 = arith.constant 0 : index
    %c1_9 = arith.constant 1 : index
    %7 = memref.load %arg3[%c0_8, %c1_9] : memref<3x4xf32, #tpu.memory_space<smem>>
    %8 = vector.broadcast %7 : f32 to vector<2x2x128xf32>
    %9 = arith.mulf %6, %8 : vector<2x2x128xf32>
    %10 = arith.addf %4, %9 : vector<2x2x128xf32>
    %c0_10 = arith.constant 0 : index
    %c2 = arith.constant 2 : index
    %c0_11 = arith.constant 0 : index
    %c0_12 = arith.constant 0 : index
    %11 = vector.load %arg2[%c0_10, %c2, %c0_11, %c0_12] : memref<2x4x2x128xf32, #tpu.memory_space<vmem>>, vector<2x1x2x128xf32>
    %12 = vector.shape_cast %11 : vector<2x1x2x128xf32> to vector<2x2x128xf32>
    %c0_13 = arith.constant 0 : index
    %c2_14 = arith.constant 2 : index
    %13 = memref.load %arg3[%c0_13, %c2_14] : memref<3x4xf32, #tpu.memory_space<smem>>
    %14 = vector.broadcast %13 : f32 to vector<2x2x128xf32>
    %15 = arith.mulf %12, %14 : vector<2x2x128xf32>
    %16 = arith.addf %10, %15 : vector<2x2x128xf32>
    %c0_15 = arith.constant 0 : index
    %c3 = arith.constant 3 : index
    %c0_16 = arith.constant 0 : index
    %c0_17 = arith.constant 0 : index
    %17 = vector.load %arg2[%c0_15, %c3, %c0_16, %c0_17] : memref<2x4x2x128xf32, #tpu.memory_space<vmem>>, vector<2x1x2x128xf32>
    %18 = vector.shape_cast %17 : vector<2x1x2x128xf32> to vector<2x2x128xf32>
    %c0_18 = arith.constant 0 : index
    %c3_19 = arith.constant 3 : index
    %19 = memref.load %arg3[%c0_18, %c3_19] : memref<3x4xf32, #tpu.memory_space<smem>>
    %20 = vector.broadcast %19 : f32 to vector<2x2x128xf32>
    %21 = arith.mulf %18, %20 : vector<2x2x128xf32>
    %22 = arith.addf %16, %21 : vector<2x2x128xf32>
    %c0_20 = arith.constant 0 : index
    %23 = memref.load %arg4[%c0_20] : memref<3xf32, #tpu.memory_space<smem>>
    %24 = vector.broadcast %23 : f32 to vector<2x2x128xf32>
    %25 = arith.addf %22, %24 : vector<2x2x128xf32>
    %c0_21 = arith.constant 0 : index
    %c0_22 = arith.constant 0 : index
    %c0_23 = arith.constant 0 : index
    %c0_24 = arith.constant 0 : index
    %26 = vector.load %arg5[%c0_21, %c0_22, %c0_23, %c0_24] : memref<2x3x2x128xf32, #tpu.memory_space<vmem>>, vector<2x1x2x128xf32>
    %27 = vector.shape_cast %26 : vector<2x1x2x128xf32> to vector<2x2x128xf32>
    %28 = vector.shape_cast %25 : vector<2x2x128xf32> to vector<2x1x2x128xf32>
    tpu.vector_store %arg5[%c0_21, %c0_22, %c0_23, %c0_24], %28 {strides = array<i32>} : memref<2x3x2x128xf32, #tpu.memory_space<vmem>>, vector<2x1x2x128xf32>,
    %c0_25 = arith.constant 0 : index
    %c0_26 = arith.constant 0 : index
    %c0_27 = arith.constant 0 : index
    %c0_28 = arith.constant 0 : index
    %29 = vector.load %arg2[%c0_25, %c0_26, %c0_27, %c0_28] : memref<2x4x2x128xf32, #tpu.memory_space<vmem>>, vector<2x1x2x128xf32>
    %30 = vector.shape_cast %29 : vector<2x1x2x128xf32> to vector<2x2x128xf32>
    %c1_29 = arith.constant 1 : index
    %c0_30 = arith.constant 0 : index
    %31 = memref.load %arg3[%c1_29, %c0_30] : memref<3x4xf32, #tpu.memory_space<smem>>
    %32 = vector.broadcast %31 : f32 to vector<2x2x128xf32>
    %33 = arith.mulf %30, %32 : vector<2x2x128xf32>
    %c0_31 = arith.constant 0 : index
    %c1_32 = arith.constant 1 : index
    %c0_33 = arith.constant 0 : index
    %c0_34 = arith.constant 0 : index
    %34 = vector.load %arg2[%c0_31, %c1_32, %c0_33, %c0_34] : memref<2x4x2x128xf32, #tpu.memory_space<vmem>>, vector<2x1x2x128xf32>
    %35 = vector.shape_cast %34 : vector<2x1x2x128xf32> to vector<2x2x128xf32>
    %c1_35 = arith.constant 1 : index
    %c1_36 = arith.constant 1 : index
    %36 = memref.load %arg3[%c1_35, %c1_36] : memref<3x4xf32, #tpu.memory_space<smem>>
    %37 = vector.broadcast %36 : f32 to vector<2x2x128xf32>
    %38 = arith.mulf %35, %37 : vector<2x2x128xf32>
    %39 = arith.addf %33, %38 : vector<2x2x128xf32>
    %c0_37 = arith.constant 0 : index
    %c2_38 = arith.constant 2 : index
    %c0_39 = arith.constant 0 : index
    %c0_40 = arith.constant 0 : index
    %40 = vector.load %arg2[%c0_37, %c2_38, %c0_39, %c0_40] : memref<2x4x2x128xf32, #tpu.memory_space<vmem>>, vector<2x1x2x128xf32>
    %41 = vector.shape_cast %40 : vector<2x1x2x128xf32> to vector<2x2x128xf32>
    %c1_41 = arith.constant 1 : index
    %c2_42 = arith.constant 2 : index
    %42 = memref.load %arg3[%c1_41, %c2_42] : memref<3x4xf32, #tpu.memory_space<smem>>
    %43 = vector.broadcast %42 : f32 to vector<2x2x128xf32>
    %44 = arith.mulf %41, %43 : vector<2x2x128xf32>
    %45 = arith.addf %39, %44 : vector<2x2x128xf32>
    %c0_43 = arith.constant 0 : index
    %c3_44 = arith.constant 3 : index
    %c0_45 = arith.constant 0 : index
    %c0_46 = arith.constant 0 : index
    %46 = vector.load %arg2[%c0_43, %c3_44, %c0_45, %c0_46] : memref<2x4x2x128xf32, #tpu.memory_space<vmem>>, vector<2x1x2x128xf32>
    %47 = vector.shape_cast %46 : vector<2x1x2x128xf32> to vector<2x2x128xf32>
    %c1_47 = arith.constant 1 : index
    %c3_48 = arith.constant 3 : index
    %48 = memref.load %arg3[%c1_47, %c3_48] : memref<3x4xf32, #tpu.memory_space<smem>>
    %49 = vector.broadcast %48 : f32 to vector<2x2x128xf32>
    %50 = arith.mulf %47, %49 : vector<2x2x128xf32>
    %51 = arith.addf %45, %50 : vector<2x2x128xf32>
    %c1_49 = arith.constant 1 : index
    %52 = memref.load %arg4[%c1_49] : memref<3xf32, #tpu.memory_space<smem>>
    %53 = vector.broadcast %52 : f32 to vector<2x2x128xf32>
    %54 = arith.addf %51, %53 : vector<2x2x128xf32>
    %c0_50 = arith.constant 0 : index
    %c1_51 = arith.constant 1 : index
    %c0_52 = arith.constant 0 : index
    %c0_53 = arith.constant 0 : index
    %55 = vector.load %arg5[%c0_50, %c1_51, %c0_52, %c0_53] : memref<2x3x2x128xf32, #tpu.memory_space<vmem>>, vector<2x1x2x128xf32>
    %56 = vector.shape_cast %55 : vector<2x1x2x128xf32> to vector<2x2x128xf32>
    %57 = vector.shape_cast %54 : vector<2x2x128xf32> to vector<2x1x2x128xf32>
    tpu.vector_store %arg5[%c0_50, %c1_51, %c0_52, %c0_53], %57 {strides = array<i32>} : memref<2x3x2x128xf32, #tpu.memory_space<vmem>>, vector<2x1x2x128xf32>,
    %c0_54 = arith.constant 0 : index
    %c0_55 = arith.constant 0 : index
    %c0_56 = arith.constant 0 : index
    %c0_57 = arith.constant 0 : index
    %58 = vector.load %arg2[%c0_54, %c0_55, %c0_56, %c0_57] : memref<2x4x2x128xf32, #tpu.memory_space<vmem>>, vector<2x1x2x128xf32>
    %59 = vector.shape_cast %58 : vector<2x1x2x128xf32> to vector<2x2x128xf32>
    %c2_58 = arith.constant 2 : index
    %c0_59 = arith.constant 0 : index
    %60 = memref.load %arg3[%c2_58, %c0_59] : memref<3x4xf32, #tpu.memory_space<smem>>
    %61 = vector.broadcast %60 : f32 to vector<2x2x128xf32>
    %62 = arith.mulf %59, %61 : vector<2x2x128xf32>
    %c0_60 = arith.constant 0 : index
    %c1_61 = arith.constant 1 : index
    %c0_62 = arith.constant 0 : index
    %c0_63 = arith.constant 0 : index
    %63 = vector.load %arg2[%c0_60, %c1_61, %c0_62, %c0_63] : memref<2x4x2x128xf32, #tpu.memory_space<vmem>>, vector<2x1x2x128xf32>
    %64 = vector.shape_cast %63 : vector<2x1x2x128xf32> to vector<2x2x128xf32>
    %c2_64 = arith.constant 2 : index
    %c1_65 = arith.constant 1 : index
    %65 = memref.load %arg3[%c2_64, %c1_65] : memref<3x4xf32, #tpu.memory_space<smem>>
    %66 = vector.broadcast %65 : f32 to vector<2x2x128xf32>
    %67 = arith.mulf %64, %66 : vector<2x2x128xf32>
    %68 = arith.addf %62, %67 : vector<2x2x128xf32>
    %c0_66 = arith.constant 0 : index
    %c2_67 = arith.constant 2 : index
    %c0_68 = arith.constant 0 : index
    %c0_69 = arith.constant 0 : index
    %69 = vector.load %arg2[%c0_66, %c2_67, %c0_68, %c0_69] : memref<2x4x2x128xf32, #tpu.memory_space<vmem>>, vector<2x1x2x128xf32>
    %70 = vector.shape_cast %69 : vector<2x1x2x128xf32> to vector<2x2x128xf32>
    %c2_70 = arith.constant 2 : index
    %c2_71 = arith.constant 2 : index
    %71 = memref.load %arg3[%c2_70, %c2_71] : memref<3x4xf32, #tpu.memory_space<smem>>
    %72 = vector.broadcast %71 : f32 to vector<2x2x128xf32>
    %73 = arith.mulf %70, %72 : vector<2x2x128xf32>
    %74 = arith.addf %68, %73 : vector<2x2x128xf32>
    %c0_72 = arith.constant 0 : index
    %c3_73 = arith.constant 3 : index
    %c0_74 = arith.constant 0 : index
    %c0_75 = arith.constant 0 : index
    %75 = vector.load %arg2[%c0_72, %c3_73, %c0_74, %c0_75] : memref<2x4x2x128xf32, #tpu.memory_space<vmem>>, vector<2x1x2x128xf32>
    %76 = vector.shape_cast %75 : vector<2x1x2x128xf32> to vector<2x2x128xf32>
    %c2_76 = arith.constant 2 : index
    %c3_77 = arith.constant 3 : index
    %77 = memref.load %arg3[%c2_76, %c3_77] : memref<3x4xf32, #tpu.memory_space<smem>>
    %78 = vector.broadcast %77 : f32 to vector<2x2x128xf32>
    %79 = arith.mulf %76, %78 : vector<2x2x128xf32>
    %80 = arith.addf %74, %79 : vector<2x2x128xf32>
    %c2_78 = arith.constant 2 : index
    %81 = memref.load %arg4[%c2_78] : memref<3xf32, #tpu.memory_space<smem>>
    %82 = vector.broadcast %81 : f32 to vector<2x2x128xf32>
    %83 = arith.addf %80, %82 : vector<2x2x128xf32>
    %c0_79 = arith.constant 0 : index
    %c2_80 = arith.constant 2 : index
    %c0_81 = arith.constant 0 : index
    %c0_82 = arith.constant 0 : index
    %84 = vector.load %arg5[%c0_79, %c2_80, %c0_81, %c0_82] : memref<2x3x2x128xf32, #tpu.memory_space<vmem>>, vector<2x1x2x128xf32>
    %85 = vector.shape_cast %84 : vector<2x1x2x128xf32> to vector<2x2x128xf32>
    %86 = vector.shape_cast %83 : vector<2x2x128xf32> to vector<2x1x2x128xf32>
    tpu.vector_store %arg5[%c0_79, %c2_80, %c0_81, %c0_82], %86 {strides = array<i32>} : memref<2x3x2x128xf32, #tpu.memory_space<vmem>>, vector<2x1x2x128xf32>,
    return
  }
  func.func @transform_0(%arg0: i32, %arg1: i32) -> (i32, i32, i32, i32) {
    %c0_i32 = arith.constant 0 : i32
    %c0_i32_0 = arith.constant 0 : i32
    %c0_i32_1 = arith.constant 0 : i32
    return %arg0, %c0_i32, %arg1, %c0_i32_0 : i32, i32, i32, i32
  }
  func.func @transform_1(%arg0: i32, %arg1: i32) -> (i32, i32) {
    %c0_i32 = arith.constant 0 : i32
    %c0_i32_0 = arith.constant 0 : i32
    %c0_i32_1 = arith.constant 0 : i32
    return %c0_i32, %c0_i32_0 : i32, i32
  }
  func.func @transform_2(%arg0: i32, %arg1: i32) -> i32 {
    %c0_i32 = arith.constant 0 : i32
    %c0_i32_0 = arith.constant 0 : i32
    return %c0_i32 : i32
  }
  func.func @transform_3(%arg0: i32, %arg1: i32) -> (i32, i32, i32, i32) {
    %c0_i32 = arith.constant 0 : i32
    %c0_i32_0 = arith.constant 0 : i32
    %c0_i32_1 = arith.constant 0 : i32
    return %arg0, %c0_i32, %arg1, %c0_i32_0 : i32, i32, i32, i32
  }
}

</mosaic_0001>

<bundles_post_ra>
// kernel: out_conv.1
= control target key start
LH: loop header
LB: loop body
LE: loop exit
PB: predicated region body
PF: predicated region fallthrough
CT: control target
= control target key end

     0   :  { %8 = vsyncpa [#allocation3], 0  ;;  %s377_s0 = inlined_call_operand.vmem [shape: f32[2,4,2,128], index: 0, kind: input, shape index: {}]   ;;  %s378_s1 = inlined_call_operand.vmem [shape: f32[3,4], index: 1, kind: input, shape index: {}]   ;;  %s379_s2 = inlined_call_operand.vmem [shape: f32[3], index: 2, kind: input, shape index: {}]   ;;  %s380_s3 = inlined_call_operand.vmem [shape: f32[2,3,2,128], index: 3, kind: output, shape index: {}]  }
   0x1   :  { %s18_s14 = sshll.u32 %s378_s1, 4  ;;  %s19_s14 = int_to_ptr.vmem [resolvable:$true] %s18_s14 }
   0x2   :  { %9 = vsyncpa [#allocation5], 0  ;;  %s28_s17 = sshll.u32 %s379_s2, 4  ;;  %s195_s18 = scalar_lea.vmem %s19_s14, 64  ;;  %s29_s17 = int_to_ptr.vmem [resolvable:$true] %s28_s17 }
   0x3   :  { %p196_p0 = scmp.ne.s32.totalorder %s19_s14, %s195_s18  ;;  %p200_p1 = scmp.lt.s32.totalorder %s19_s14, %s19_s14 }
   0x4   :  { %p201_p2 = scmp.lt.s32.totalorder %s195_s18, %s195_s18 }
   0x6   :  { %p202_p3 = por %p201_p2, %p200_p1 }
   0x8   :  { %p203_p4 = pnand %p202_p3, %p196_p0 }
   0xa   :  { %206 = shalt.err (!%p203_p4)
}
   0xb   :  { %s223_s19 = smov [#allocation2]   ;;  %s207_s20 = scalar_lea.vmem %s29_s17, 16 }
   0xc   :  { %21 = dma.vmem_to_smem %s19_s14, 64, %s223_s19, [#allocation3]  }
   0xd   :  { %p208_p5 = scmp.ne.s32.totalorder %s29_s17, %s207_s20  ;;  %p212_p6 = scmp.lt.s32.totalorder %s29_s17, %s29_s17 }
   0xe   :  { %p213_p7 = scmp.lt.s32.totalorder %s207_s20, %s207_s20 }
  0x10   :  { %p214_p8 = por %p213_p7, %p212_p6 }
  0x12   :  { %p215_p9 = pnand %p214_p8, %p208_p5 }
  0x14   :  { %218 = shalt.err (!%p215_p9)
}
  0x15   :  { %s224_s1 = smov [#allocation4]  }
  0x16   :  { %31 = dma.vmem_to_smem %s29_s17, 16, %s224_s1, [#allocation5]  }
  0x17   :  { %219 = dma.done.wait [#allocation3], 64  }
  0x18   :  { %220 = vsyncadd [#allocation3], 4294967232 }
  0x19   :  { %221 = dma.done.wait [#allocation5], 16  }
  0x1a   :  { %222 = vsyncadd [#allocation5], 4294967280 }
  0x1b   :  { %38 = sfence }
  0x1c   :  { %s41_s2 = sld [smem:[#allocation2]]  ;;  %s160_s21 = sld [smem:[#allocation2 + $0x1]]  ;;  %v39_v0 = vld [vmem:[%s377_s0] sm:$0x3]  ;;  %v158_v1 = vld [vmem:[%s377_s0 + $0x2] sm:$0x3] }
  0x1d   :  { %s163_s22 = sld [smem:[#allocation2 + $0x2]]  ;;  %s251_s23 = sld [smem:[#allocation2 + $0x3]]  ;;  %v40_v2 = vld [vmem:[%s377_s0 + $0x8] sm:$0x3]  ;;  %v161_v3 = vld [vmem:[%s377_s0 + $0x4] sm:$0x3] }
  0x1e   :  { %s253_s24 = sld [smem:[#allocation4]]  ;;  %v159_v4 = vld [vmem:[%s377_s0 + $0xa] sm:$0x3]  ;;  %s272_s9 = sld [smem:[#allocation2 + $0x81]]  ;;  %v162_v6 = vld [vmem:[%s377_s0 + $0xc] sm:$0x3] }
  0x1f   :  { %s264_s4 = sld [smem:[#allocation2 + $0x80]]  ;;  %s277_s12 = sld [smem:[#allocation2 + $0x82]]  ;;  %v164_v10 = vld [vmem:[%s377_s0 + $0x6] sm:$0x3]  ;;  %v165_v12 = vld [vmem:[%s377_s0 + $0xe] sm:$0x3] }
  0x20   :  { %s279_s13 = sld [smem:[#allocation2 + $0x83]]  ;;  %s287_s18 = sld [smem:[#allocation4 + $0x1]]  ;;  %v78_v16 = vld [vmem:[%s377_s0] sm:$0x3]  ;;  %v79_v17 = vld [vmem:[%s377_s0 + $0x8] sm:$0x3] }
  0x21   :  { %v168_v21 = vld [vmem:[%s377_s0 + $0x2] sm:$0x3]  ;;  %s302_s26 = sld [smem:[#allocation2 + $0x101]]  ;;  %v171_v26 = vld [vmem:[%s377_s0 + $0x4] sm:$0x3]  ;;  %s311_s29 = sld [smem:[#allocation2 + $0x102]] }
  0x22   :  { %v42_v5 = vstv %s41_s2  ;;  %v49_v8 = vstv %s160_s21  ;;  %s296_s21 = sld [smem:[#allocation2 + $0x100]]  ;;  %v174_v27 = vld [vmem:[%s377_s0 + $0x6] sm:$0x3]  ;;  %v169_v32 = vld [vmem:[%s377_s0 + $0xa] sm:$0x3]  ;;  %s320_s7 = sld [smem:[#allocation2 + $0x103]] }
  0x23   :  { %v43_v7 = vmul.f32 %v42_v5, %v39_v0  ;;  %v58_v9 = vstv %s163_s22  ;;  %v44_v11 = vmul.f32 %v42_v5, %v40_v2  ;;  %v50_v13 = vmul.f32 %v158_v1, %v49_v8  ;;  %v172_v33 = vld [vmem:[%s377_s0 + $0xc] sm:$0x3]  ;;  %v175_v38 = vld [vmem:[%s377_s0 + $0xe] sm:$0x3]  ;;  %v115_v43 = vld [vmem:[%s377_s0] sm:$0x3] }
  0x24   :  { %v59_v14 = vmul.f32 %v161_v3, %v58_v9  ;;  %v67_v15 = vstv %s251_s23  ;;  %v73_v18 = vstv %s253_s24  ;;  %v51_v19 = vmul.f32 %v159_v4, %v49_v8  ;;  %v181_v48 = vld [vmem:[%s377_s0 + $0x2] sm:$0x3]  ;;  %v184_v53 = vld [vmem:[%s377_s0 + $0x4] sm:$0x3] }
  0x25   :  { %v60_v20 = vmul.f32 %v162_v6, %v58_v9  ;;  %v52_v22 = vadd.f32 %v50_v13, %v43_v7  ;;  %v68_v23 = vmul.f32 %v164_v10, %v67_v15  ;;  %v69_v24 = vmul.f32 %v165_v12, %v67_v15  ;;  %v187_v58 = vld [vmem:[%s377_s0 + $0x6] sm:$0x3]  ;;  %v116_v59 = vld [vmem:[%s377_s0 + $0x8] sm:$0x3]  ;;  %v182_v60 = vld [vmem:[%s377_s0 + $0xa] sm:$0x3] }
  0x26   :  { %v81_v25 = vstv %s264_s4  ;;  %v53_v28 = vadd.f32 %v51_v19, %v44_v11  ;;  %v87_v30 = vstv %s272_s9  ;;  %v95_v36 = vstv %s277_s12  ;;  %v185_v1 = vld [vmem:[%s377_s0 + $0xc] sm:$0x3] }
  0x27   :  { %v82_v29 = vmul.f32 %v81_v25, %v78_v16  ;;  %v83_v31 = vmul.f32 %v81_v25, %v79_v17  ;;  %v61_v34 = vadd.f32 %v59_v14, %v52_v22  ;;  %v88_v35 = vmul.f32 %v168_v21, %v87_v30  ;;  %v188_v5 = vld [vmem:[%s377_s0 + $0xe] sm:$0x3] }
  0x28   :  { %v103_v37 = vstv %s279_s13  ;;  %v62_v39 = vadd.f32 %v60_v20, %v53_v28  ;;  %v96_v40 = vmul.f32 %v171_v26, %v95_v36  ;;  %v109_v42 = vstv %s287_s18  ;;  %s334_s13 = sld [smem:[#allocation4 + $0x2]] }
  0x29   :  { %v104_v41 = vmul.f32 %v174_v27, %v103_v37  ;;  %v70_v44 = vadd.f32 %v68_v23, %v61_v34  ;;  %v90_v45 = vadd.f32 %v88_v35, %v82_v29  ;;  %v89_v46 = vmul.f32 %v169_v32, %v87_v30 }
  0x2a   :  { %v97_v47 = vmul.f32 %v172_v33, %v95_v36  ;;  %v71_v49 = vadd.f32 %v69_v24, %v62_v39  ;;  %v105_v50 = vmul.f32 %v175_v38, %v103_v37  ;;  %v118_v51 = vstv %s296_s21 }
  0x2b   :  { %v124_v52 = vstv %s302_s26  ;;  %v74_v54 = vadd.f32 %v73_v18, %v70_v44  ;;  %v98_v55 = vadd.f32 %v96_v40, %v90_v45  ;;  %v91_v56 = vadd.f32 %v89_v46, %v83_v31 }
  0x2c   :  { %v119_v57 = vmul.f32 %v118_v51, %v115_v43  ;;  %v75_v61 = vadd.f32 %v73_v18, %v71_v49  ;;  %v125_v62 = vmul.f32 %v181_v48, %v124_v52  ;;  %v132_v63 = vstv %s311_s29 }
  0x2d   :  { %v140_v0 = vstv %s320_s7  ;;  %76 = vst [vmem:[%s380_s3] sm:$0x3] %v74_v54  ;;  %v106_v2 = vadd.f32 %v104_v41, %v98_v55  ;;  %v99_v3 = vadd.f32 %v97_v47, %v91_v56  ;;  %v133_v4 = vmul.f32 %v184_v53, %v132_v63 }
  0x2e   :  { %77 = vst [vmem:[%s380_s3 + $0x6] sm:$0x3] %v75_v61  ;;  %v127_v6 = vadd.f32 %v125_v62, %v119_v57  ;;  %v141_v7 = vmul.f32 %v187_v58, %v140_v0  ;;  %v120_v8 = vmul.f32 %v118_v51, %v116_v59  ;;  %v126_v9 = vmul.f32 %v182_v60, %v124_v52 }
  0x2f   :  { %v110_v10 = vadd.f32 %v109_v42, %v106_v2  ;;  %v107_v11 = vadd.f32 %v105_v50, %v99_v3  ;;  %v134_v12 = vmul.f32 %v185_v1, %v132_v63  ;;  %v142_v15 = vmul.f32 %v188_v5, %v140_v0 }
  0x30   :  { %v135_v13 = vadd.f32 %v133_v4, %v127_v6  ;;  %v128_v14 = vadd.f32 %v126_v9, %v120_v8  ;;  %v146_v17 = vstv %s334_s13 }
  0x31   :  { %178 = vst [vmem:[%s380_s3 + $0x2] sm:$0x3] %v110_v10  ;;  %v111_v16 = vadd.f32 %v109_v42, %v107_v11 }
  0x32   :  { %v143_v18 = vadd.f32 %v141_v7, %v135_v13  ;;  %v136_v19 = vadd.f32 %v134_v12, %v128_v14 }
  0x33   :  { %179 = vst [vmem:[%s380_s3 + $0x8] sm:$0x3] %v111_v16 }
  0x34   :  { %v147_v20 = vadd.f32 %v146_v17, %v143_v18  ;;  %v144_v21 = vadd.f32 %v142_v15, %v136_v19 }
  0x36   :  { %191 = vst [vmem:[%s380_s3 + $0x4] sm:$0x3] %v147_v20  ;;  %v148_v22 = vadd.f32 %v146_v17, %v144_v21 }
  0x38   :  { %192 = vst [vmem:[%s380_s3 + $0xa] sm:$0x3] %v148_v22 }
  0x39   :  { %156 = vsyncpa [#allocation3], 1 }
  0x3a   :  { %157 = vsyncpa [#allocation5], 1 }

</bundles_post_ra>
